<compile_context>
chip_gen: v7x
topology: tpu7x:2x2x1
jax: 0.10.0
libtpu: 0.0.40
codegen_flags: <defaults>
</compile_context>

<pallas_src>
import jax
import jax.numpy as jnp
from jax.experimental import pallas as pl
from jax.experimental.pallas import tpu as pltpu


def _round_up(x: int, m: int) -> int:
    return ((x + m - 1) // m) * m


def _vmem_capacity_bytes() -> int:
    try:
        info = pltpu.get_tpu_info()
        cap = getattr(info, "vmem_capacity_bytes", None)
        if cap:
            return int(cap)
    except Exception:
        pass
    return 64 * 1024 * 1024  # conservative fallback (v7x per-TensorCore VMEM)


def _choose_tiles(batch: int, num_classes: int, itemsize: int, sub: int,
                  vmem_cap: int):
    """Pick (tm, tk) = (batch tile, class tile).

    Budget one (tm, tk) f32 working tile at ~1/10 of physical VMEM so the
    double-buffered input tile plus a few fused f32 temporaries stay well under
    ~3/4 of VMEM on every generation (v7x has only 64 MiB per TensorCore).
    """
    f32_budget = max(1 << 20, vmem_cap // 10)
    batch_r = _round_up(batch, sub)

    rows_full_k = (f32_budget // max(1, num_classes * 4)) // sub * sub
    if rows_full_k >= sub:
        # full class axis in one tile (common case)
        tk = num_classes
        tm = min(rows_full_k, batch_r, 1024)
        # prefer >= 2 grid steps along the batch axis: a single-tile grid cannot
        # be sharded across v7x's two TensorCores and cannot pipeline.
        if batch_r > sub and tm >= batch_r:
            tm = max(sub, _round_up(pl.cdiv(batch, 2), sub))
        return tm, tk

    # Huge vocabulary: tile the class axis, online-logsumexp carry in the kernel.
    tm = min(batch_r, 256)
    tk = max(128, (f32_budget // (tm * 4)) // 128 * 128)
    return tm, tk


def _make_ce_kernel(num_classes: int, epsilon: float, block_cols: int,
                    num_col_tiles: int):
    eps = float(epsilon)
    base = eps / float(num_classes)
    conf = 1.0 - eps
    need_mask = (num_col_tiles * block_cols) != num_classes

    def kernel(logits_ref, targets_ref, out_ref, m_sc, l_sc, w_sc):
        # logits_ref: (tm, tk) input dtype; targets_ref: (tm, 1) int32
        # out_ref: (tm, 1) f32 per-sample losses; m/l/w scratch: (tm, 1) f32
        k = pl.program_id(1)

        @pl.when(k == 0)
        def _init():
            m_sc[...] = jnp.full_like(m_sc, -jnp.inf)
            l_sc[...] = jnp.zeros_like(l_sc)
            w_sc[...] = jnp.zeros_like(w_sc)

        x = logits_ref[...].astype(jnp.float32)                      # (tm, tk)
        t = targets_ref[...]                                         # (tm, 1)
        class_ids = k * block_cols + jax.lax.broadcasted_iota(jnp.int32, x.shape, 1)

        if need_mask:  # last class tile extends past num_classes
            valid = class_ids < num_classes
            x_max = jnp.where(valid, x, -jnp.inf)
            x_sum = jnp.where(valid, x, 0.0)
        else:
            x_max = x
            x_sum = x

        # online logsumexp carry across class tiles (degenerates to plain
        # logsumexp when num_col_tiles == 1)
        m_new = jnp.maximum(m_sc[...], jnp.max(x_max, axis=1, keepdims=True))
        alpha = jnp.exp(m_sc[...] - m_new)
        p_sum = jnp.sum(jnp.exp(x_max - m_new), axis=1, keepdims=True)
        l_sc[...] = alpha * l_sc[...] + p_sum
        m_sc[...] = m_new

        # weighted-label term: eps/K * sum_k x_k + (1 - eps) * x_target
        # (no (tm, tk) "smoothed" temporary is materialized)
        tgt_x = jnp.sum(jnp.where(class_ids == t, x, 0.0), axis=1, keepdims=True)
        w_sc[...] = w_sc[...] + base * jnp.sum(x_sum, axis=1, keepdims=True) + conf * tgt_x

        @pl.when(k == pl.num_programs(1) - 1)
        def _finalize():
            out_ref[...] = m_sc[...] + jnp.log(l_sc[...]) - w_sc[...]

    return kernel


def cross_entropy_label_smooth(logits, targets, num_classes, epsilon=0.1,
                               reduction=True, block_rows=None, block_cols=None):
    """Pallas implementation of CrossEntropyLabelSmooth.forward.

    logits:  (B, K) float array (pre-softmax scores).
    targets: (B,) int array of class indices.
    """
    B, K = logits.shape
    assert K == num_classes
    itemsize = jnp.dtype(logits.dtype).itemsize
    sub = 16 if itemsize < 4 else 8  # sublane multiple (bf16 packs 16 rows/vreg)

    vmem_cap = _vmem_capacity_bytes()
    tm_auto, tk_auto = _choose_tiles(B, K, itemsize, sub, vmem_cap)
    tm = _round_up(int(block_rows), sub) if block_rows is not None else tm_auto
    tk = min(int(block_cols), K) if block_cols is not None else tk_auto
    assert tk == K or tk % 128 == 0, "class tile must be full-K or a multiple of 128"

    n_row_tiles = pl.cdiv(B, tm)
    n_col_tiles = pl.cdiv(K, tk)
    b_pad = n_row_tiles * tm

    # targets are tiny: pad so every (tm, 1) block is in-bounds. Logits are NOT
    # padded (no extra HBM copy); the partial last row block yields garbage rows
    # that are per-row independent and sliced off below.
    t = targets.astype(jnp.int32)
    if b_pad != B:
        t = jnp.pad(t, (0, b_pad - B))
    t2 = t.reshape(b_pad, 1)

    # VMEM budget: double-buffered input tile + a few fused f32 temporaries,
    # never more than ~3/4 of physical VMEM (v7x headroom).
    in_tile = tm * tk * itemsize
    f32_tile = tm * tk * 4
    vmem_limit = int(min(vmem_cap * 3 // 4,
                         max(32 << 20, 2 * in_tile + 5 * f32_tile + (1 << 20))))

    kernel = _make_ce_kernel(num_classes, epsilon, tk, n_col_tiles)

    per_sample_padded = pl.pallas_call(
        kernel,
        out_shape=jax.ShapeDtypeStruct((b_pad, 1), jnp.float32),
        grid=(n_row_tiles, n_col_tiles),
        in_specs=[
            pl.BlockSpec((tm, tk), lambda i, k: (i, k)),
            pl.BlockSpec((tm, 1), lambda i, k: (i, 0)),
        ],
        out_specs=pl.BlockSpec((tm, 1), lambda i, k: (i, 0)),
        scratch_shapes=[pltpu.VMEM((tm, 1), jnp.float32)] * 3,
        compiler_params=pltpu.CompilerParams(
            dimension_semantics=("parallel", "arbitrary"),
            vmem_limit_bytes=vmem_limit,
        ),
    )(logits, t2)

    per_sample = per_sample_padded[:B, 0]
    if reduction:
        return jnp.sum(per_sample) / B  # mean over the true batch size
    return per_sample


def _reference(logits, targets, num_classes, epsilon=0.1, reduction=True):
    log_probs = jax.nn.log_softmax(logits.astype(jnp.float32), axis=1)
    onehot = jax.nn.one_hot(targets, num_classes, dtype=jnp.float32)
    smoothed = (1.0 - epsilon) * onehot + epsilon / num_classes
    loss = jnp.sum(-smoothed * log_probs, axis=1)
    return jnp.mean(loss) if reduction else loss


def _check(out, ref, atol=1e-4, rtol=1e-5):
    assert jnp.allclose(out, ref, atol=atol, rtol=rtol), (out, ref)


if __name__ == "__main__":
    epsilon = 0.1
    root = jax.random.PRNGKey(0)

    # 1) small f32, mean + per-sample
    K = 16
    B = 8
    k1, k2, root = jax.random.split(root, 3)
    logits = jax.random.normal(k1, (B, K), dtype=jnp.float32)
    targets = jax.random.randint(k2, (B,), 0, K, dtype=jnp.int32)
    out = jax.block_until_ready(
        cross_entropy_label_smooth(logits, targets, K, epsilon, reduction=True))
    _check(out, _reference(logits, targets, K, epsilon, reduction=True))
    out_ps = jax.block_until_ready(
        cross_entropy_label_smooth(logits, targets, K, epsilon, reduction=False))
    _check(out_ps, _reference(logits, targets, K, epsilon, reduction=False))

    # 2) batch not a tile multiple (partial last row block, no logits pad copy)
    B = 37
    k1, k2, root = jax.random.split(root, 3)
    logits = jax.random.normal(k1, (B, K), dtype=jnp.float32)
    targets = jax.random.randint(k2, (B,), 0, K, dtype=jnp.int32)
    out = jax.block_until_ready(
        cross_entropy_label_smooth(logits, targets, K, epsilon, reduction=True))
    _check(out, _reference(logits, targets, K, epsilon, reduction=True))

    # 3) multi-row-tile per-sample path
    B = 300
    k1, k2, root = jax.random.split(root, 3)
    logits = jax.random.normal(k1, (B, K), dtype=jnp.float32)
    targets = jax.random.randint(k2, (B,), 0, K, dtype=jnp.int32)
    out = jax.block_until_ready(
        cross_entropy_label_smooth(logits, targets, K, epsilon, reduction=False))
    _check(out, _reference(logits, targets, K, epsilon, reduction=False))

    # 4) forced class-axis tiling (online logsumexp carry), K divisible by tile
    B, K2 = 32, 512
    k1, k2, root = jax.random.split(root, 3)
    logits = jax.random.normal(k1, (B, K2), dtype=jnp.float32)
    targets = jax.random.randint(k2, (B,), 0, K2, dtype=jnp.int32)
    out = jax.block_until_ready(
        cross_entropy_label_smooth(logits, targets, K2, epsilon, reduction=True,
                                   block_cols=128))
    _check(out, _reference(logits, targets, K2, epsilon, reduction=True))

    # 5) forced class-axis tiling with a masked tail class tile (K % 128 != 0)
    B, K3 = 16, 200
    k1, k2, root = jax.random.split(root, 3)
    logits = jax.random.normal(k1, (B, K3), dtype=jnp.float32)
    targets = jax.random.randint(k2, (B,), 0, K3, dtype=jnp.int32)
    out = jax.block_until_ready(
        cross_entropy_label_smooth(logits, targets, K3, epsilon, reduction=False,
                                   block_cols=128))
    _check(out, _reference(logits, targets, K3, epsilon, reduction=False))

    # 6) bf16 logits stay bf16 in HBM; upcast inside the kernel
    B, K4 = 24, 64
    k1, k2, root = jax.random.split(root, 3)
    logits = jax.random.normal(k1, (B, K4), dtype=jnp.float32).astype(jnp.bfloat16)
    targets = jax.random.randint(k2, (B,), 0, K4, dtype=jnp.int32)
    out = jax.block_until_ready(
        cross_entropy_label_smooth(logits, targets, K4, epsilon, reduction=True))
    _check(out, _reference(logits, targets, K4, epsilon, reduction=True))

    print("KERNEL_OK")
</pallas_src>

<mosaic_0001>
module attributes {stable_mosaic.version = 11 : i64} {
  func.func @kernel(%arg0: i32, %arg1: i32, %arg2: memref<8x16xf32, #tpu.memory_space<vmem>>, %arg3: memref<8x1xi32, #tpu.memory_space<vmem>>, %arg4: memref<8x1xf32, #tpu.memory_space<vmem>>, %arg5: memref<8x1xf32, #tpu.memory_space<vmem>>, %arg6: memref<8x1xf32, #tpu.memory_space<vmem>>, %arg7: memref<8x1xf32, #tpu.memory_space<vmem>>) attributes {dimension_semantics = [#tpu.dimension_semantics<parallel>, #tpu.dimension_semantics<arbitrary>], iteration_bounds = array<i64: 1, 1>, scalar_prefetch = 0 : i64, scratch_operands = 3 : i64, tpu.core_type = #tpu.core_type<tc>, window_params = [{transform_indices = @transform_0, window_bounds = array<i64: 8, 16>}, {transform_indices = @transform_1, window_bounds = array<i64: 8, 1>}, {transform_indices = @transform_2, window_bounds = array<i64: 8, 1>}]} {
    %c0_i32 = arith.constant 0 : i32
    %0 = arith.cmpi eq, %arg1, %c0_i32 : i32
    %1 = arith.extui %0 : i1 to i32
    %c0_i32_0 = arith.constant 0 : i32
    %2 = arith.cmpi ne, %1, %c0_i32_0 : i32
    scf.if %2 {
      %cst_26 = arith.constant 0xFF800000 : f32
      %45 = vector.broadcast %cst_26 : f32 to vector<8x1xf32>
      %c0_27 = arith.constant 0 : index
      %c0_28 = arith.constant 0 : index
      %46 = vector.load %arg5[%c0_27, %c0_28] : memref<8x1xf32, #tpu.memory_space<vmem>>, vector<8x1xf32>
      tpu.vector_store %arg5[%c0_27, %c0_28], %45 {strides = array<i32>} : memref<8x1xf32, #tpu.memory_space<vmem>>, vector<8x1xf32>,
      %cst_29 = arith.constant 0.000000e+00 : f32
      %47 = vector.broadcast %cst_29 : f32 to vector<8x1xf32>
      %c0_30 = arith.constant 0 : index
      %c0_31 = arith.constant 0 : index
      %48 = vector.load %arg6[%c0_30, %c0_31] : memref<8x1xf32, #tpu.memory_space<vmem>>, vector<8x1xf32>
      tpu.vector_store %arg6[%c0_30, %c0_31], %47 {strides = array<i32>} : memref<8x1xf32, #tpu.memory_space<vmem>>, vector<8x1xf32>,
      %cst_32 = arith.constant 0.000000e+00 : f32
      %49 = vector.broadcast %cst_32 : f32 to vector<8x1xf32>
      %c0_33 = arith.constant 0 : index
      %c0_34 = arith.constant 0 : index
      %50 = vector.load %arg7[%c0_33, %c0_34] : memref<8x1xf32, #tpu.memory_space<vmem>>, vector<8x1xf32>
      tpu.vector_store %arg7[%c0_33, %c0_34], %49 {strides = array<i32>} : memref<8x1xf32, #tpu.memory_space<vmem>>, vector<8x1xf32>,
    } else {
    }
    %c0 = arith.constant 0 : index
    %c0_1 = arith.constant 0 : index
    %3 = vector.load %arg2[%c0, %c0_1] : memref<8x16xf32, #tpu.memory_space<vmem>>, vector<8x16xf32>
    %c0_2 = arith.constant 0 : index
    %c0_3 = arith.constant 0 : index
    %4 = vector.load %arg3[%c0_2, %c0_3] : memref<8x1xi32, #tpu.memory_space<vmem>>, vector<8x1xi32>
    %c16_i32 = arith.constant 16 : i32
    %5 = arith.muli %arg1, %c16_i32 : i32
    %6 = tpu.iota {dimensions = array<i32: 1>} : vector<8x16xi32>
    %7 = vector.broadcast %5 : i32 to vector<8x16xi32>
    %8 = arith.addi %7, %6 : vector<8x16xi32>
    %c0_4 = arith.constant 0 : index
    %c0_5 = arith.constant 0 : index
    %9 = vector.load %arg5[%c0_4, %c0_5] : memref<8x1xf32, #tpu.memory_space<vmem>>, vector<8x1xf32>
    %cst = arith.constant dense<0xFF800000> : vector<8xf32>
    %10 = vector.multi_reduction <maximumf>, %3, %cst [1] : vector<8x16xf32> to vector<8xf32>
    %11 = vector.shape_cast %10 : vector<8xf32> to vector<8x1xf32>
    %12 = arith.maximumf %9, %11 : vector<8x1xf32>
    %c0_6 = arith.constant 0 : index
    %c0_7 = arith.constant 0 : index
    %13 = vector.load %arg5[%c0_6, %c0_7] : memref<8x1xf32, #tpu.memory_space<vmem>>, vector<8x1xf32>
    %14 = arith.subf %13, %12 : vector<8x1xf32>
    %15 = math.exp %14 : vector<8x1xf32>
    %16 = vector.broadcast %12 : vector<8x1xf32> to vector<8x16xf32>
    %17 = arith.subf %3, %16 : vector<8x16xf32>
    %18 = math.exp %17 : vector<8x16xf32>
    %cst_8 = arith.constant dense<0.000000e+00> : vector<8xf32>
    %19 = vector.multi_reduction <add>, %18, %cst_8 [1] : vector<8x16xf32> to vector<8xf32>
    %20 = vector.shape_cast %19 : vector<8xf32> to vector<8x1xf32>
    %c0_9 = arith.constant 0 : index
    %c0_10 = arith.constant 0 : index
    %21 = vector.load %arg6[%c0_9, %c0_10] : memref<8x1xf32, #tpu.memory_space<vmem>>, vector<8x1xf32>
    %22 = arith.mulf %15, %21 : vector<8x1xf32>
    %23 = arith.addf %22, %20 : vector<8x1xf32>
    %c0_11 = arith.constant 0 : index
    %c0_12 = arith.constant 0 : index
    %24 = vector.load %arg6[%c0_11, %c0_12] : memref<8x1xf32, #tpu.memory_space<vmem>>, vector<8x1xf32>
    tpu.vector_store %arg6[%c0_11, %c0_12], %23 {strides = array<i32>} : memref<8x1xf32, #tpu.memory_space<vmem>>, vector<8x1xf32>,
    %c0_13 = arith.constant 0 : index
    %c0_14 = arith.constant 0 : index
    %25 = vector.load %arg5[%c0_13, %c0_14] : memref<8x1xf32, #tpu.memory_space<vmem>>, vector<8x1xf32>
    tpu.vector_store %arg5[%c0_13, %c0_14], %12 {strides = array<i32>} : memref<8x1xf32, #tpu.memory_space<vmem>>, vector<8x1xf32>,
    %26 = vector.broadcast %4 : vector<8x1xi32> to vector<8x16xi32>
    %27 = arith.cmpi eq, %8, %26 : vector<8x16xi32>
    %cst_15 = arith.constant 0.000000e+00 : f32
    %28 = vector.broadcast %cst_15 : f32 to vector<8x16xf32>
    %29 = arith.select %27, %3, %28 : vector<8x16xi1>, vector<8x16xf32>
    %cst_16 = arith.constant dense<0.000000e+00> : vector<8xf32>
    %30 = vector.multi_reduction <add>, %29, %cst_16 [1] : vector<8x16xf32> to vector<8xf32>
    %31 = vector.shape_cast %30 : vector<8xf32> to vector<8x1xf32>
    %c0_17 = arith.constant 0 : index
    %c0_18 = arith.constant 0 : index
    %32 = vector.load %arg7[%c0_17, %c0_18] : memref<8x1xf32, #tpu.memory_space<vmem>>, vector<8x1xf32>
    %cst_19 = arith.constant dense<0.000000e+00> : vector<8xf32>
    %33 = vector.multi_reduction <add>, %3, %cst_19 [1] : vector<8x16xf32> to vector<8xf32>
    %34 = vector.shape_cast %33 : vector<8xf32> to vector<8x1xf32>
    %cst_20 = arith.constant 6.250000e-03 : f32
    %35 = vector.broadcast %cst_20 : f32 to vector<8x1xf32>
    %36 = arith.mulf %35, %34 : vector<8x1xf32>
    %37 = arith.addf %32, %36 : vector<8x1xf32>
    %cst_21 = arith.constant 0.899999976 : f32
    %38 = vector.broadcast %cst_21 : f32 to vector<8x1xf32>
    %39 = arith.mulf %38, %31 : vector<8x1xf32>
    %40 = arith.addf %37, %39 : vector<8x1xf32>
    %c0_22 = arith.constant 0 : index
    %c0_23 = arith.constant 0 : index
    %41 = vector.load %arg7[%c0_22, %c0_23] : memref<8x1xf32, #tpu.memory_space<vmem>>, vector<8x1xf32>
    tpu.vector_store %arg7[%c0_22, %c0_23], %40 {strides = array<i32>} : memref<8x1xf32, #tpu.memory_space<vmem>>, vector<8x1xf32>,
    %c0_i32_24 = arith.constant 0 : i32
    %42 = arith.cmpi eq, %arg1, %c0_i32_24 : i32
    %43 = arith.extui %42 : i1 to i32
    %c0_i32_25 = arith.constant 0 : i32
    %44 = arith.cmpi ne, %43, %c0_i32_25 : i32
    scf.if %44 {
      %c0_26 = arith.constant 0 : index
      %c0_27 = arith.constant 0 : index
      %45 = vector.load %arg5[%c0_26, %c0_27] : memref<8x1xf32, #tpu.memory_space<vmem>>, vector<8x1xf32>
      %c0_28 = arith.constant 0 : index
      %c0_29 = arith.constant 0 : index
      %46 = vector.load %arg6[%c0_28, %c0_29] : memref<8x1xf32, #tpu.memory_space<vmem>>, vector<8x1xf32>
      %47 = math.log %46 : vector<8x1xf32>
      %48 = arith.addf %45, %47 : vector<8x1xf32>
      %c0_30 = arith.constant 0 : index
      %c0_31 = arith.constant 0 : index
      %49 = vector.load %arg7[%c0_30, %c0_31] : memref<8x1xf32, #tpu.memory_space<vmem>>, vector<8x1xf32>
      %50 = arith.subf %48, %49 : vector<8x1xf32>
      %c0_32 = arith.constant 0 : index
      %c0_33 = arith.constant 0 : index
      %51 = vector.load %arg4[%c0_32, %c0_33] : memref<8x1xf32, #tpu.memory_space<vmem>>, vector<8x1xf32>
      tpu.vector_store %arg4[%c0_32, %c0_33], %50 {strides = array<i32>} : memref<8x1xf32, #tpu.memory_space<vmem>>, vector<8x1xf32>,
    } else {
    }
    return
  }
  func.func @transform_0(%arg0: i32, %arg1: i32) -> (i32, i32) {
    %c0_i32 = arith.constant 0 : i32
    return %arg0, %arg1 : i32, i32
  }
  func.func @transform_1(%arg0: i32, %arg1: i32) -> (i32, i32) {
    %c0_i32 = arith.constant 0 : i32
    %c0_i32_0 = arith.constant 0 : i32
    return %arg0, %c0_i32 : i32, i32
  }
  func.func @transform_2(%arg0: i32, %arg1: i32) -> (i32, i32) {
    %c0_i32 = arith.constant 0 : i32
    %c0_i32_0 = arith.constant 0 : i32
    return %arg0, %c0_i32 : i32, i32
  }
}

</mosaic_0001>

<bundles_post_ra>
// kernel: tpu_custom_call.1
= control target key start
LH: loop header
LB: loop body
LE: loop exit
PB: predicated region body
PF: predicated region fallthrough
CT: control target
= control target key end

     0   :  { %vm27_vm0 = vcmask 130048   ;;  %vm15_vm1 = vcmask 7168   ;;  %v95_v1 = vmov -inf   ;;  %v96_v3 = vmov 0   ;;  %s133_s0 = inlined_call_operand.vmem [shape: f32[8,16], index: 0, kind: input, shape index: {}]   ;;  %s134_s1 = inlined_call_operand.vmem [shape: s32[8,1], index: 1, kind: input, shape index: {}]   ;;  %s135_s2 = inlined_call_operand.vmem [shape: f32[8,1], index: 2, kind: output, shape index: {}]  }
   0x1   :  { %v19_v0 = vld [vmem:[%s133_s0] sm:$0xff]  ;;  %16 = vst.msk [vmem:[#allocation2] sm:$0xff] %vm15_vm1, %v95_v1  ;;  %87 = vset.pattern.permute.xlu0 %v96_v3  ;;  %88 = vset.pattern.permute.xlu1 %v96_v3  ;;  %v97_v4 = vmov 0.0   ;;  %v22_v13 = vlaneseq }
   0x2   :  { %v28_v2 = vsel %vm27_vm0, %v19_v0, -inf  ;;  %17 = vst.msk [vmem:[#allocation3] sm:$0xff] %vm15_vm1, %v97_v4  ;;  %18 = vst.msk [vmem:[#allocation4] sm:$0xff] %vm15_vm1, %v97_v4  ;;  %v20_v5 = vld [vmem:[%s134_s1] sm:$0xff]  ;;  %v61_v18 = vsel %vm27_vm0, %v19_v0, 0.0 }
   0x3   :  { %29 = vmax.xlane.f32.xlu0 %v28_v2  ;;  %53 = vperm.xlu1 %88, %v20_v5   ;;  %v23_v14 = vand.u32 127, %v22_v13 }
   0x8   :  { %v26_v6 = vld [vmem:[#allocation2] sm:$0xff] }
   0x9   :  { %v46_v23 = vld [vmem:[#allocation3] sm:$0xff]  ;;  %v60_v27 = vld [vmem:[#allocation4] sm:$0xff] }
  0x82   :  { %v54_v15 = vpop.permute.xlu1 %53 }
  0x83   :  { %vm55_vm2 = vcmp.eq.s32.totalorder %v23_v14, %v54_v15 }
  0x84   :  { %v56_v19 = vsel %vm55_vm2, %v19_v0, 0.0 }
  0x85   :  { %v57_v20 = vsel %vm27_vm0, %v56_v19, 0.0 }
  0x90   :  { %v30_v7 = vpop.xlane.xlu0 %29 }
  0x91   :  { %v31_v8 = vmax.f32 %v26_v6, %v30_v7 }
  0x93   :  { %v32_v9 = vsub.f32 %v26_v6, %v31_v8  ;;  %51 = vst.msk [vmem:[#allocation2] sm:$0xff] %vm15_vm1, %v31_v8  ;;  %37 = vperm.xlu0 %87, %v31_v8  }
  0x95   :  { %v33_v21 = vmul.f32 1.442695, %v32_v9 }
  0x9a   :  { %v72_v37 = vld [vmem:[#allocation2] sm:$0xff] }
 0x112   :  { %v38_v10 = vpop.permute.xlu0 %37 }
 0x113   :  { %v40_v11 = vsub.f32 %v19_v0, %v38_v10 }
 0x115   :  { %v41_v12 = vmul.f32 1.442695, %v40_v11 }
 0x117   :  { %89 = vpow2.f32 %v41_v12 }
 0x118   :  { %91 = vpow2.f32 %v33_v21 }
 0x121   :  { %v90_v16 = vpop.eup %89 }
 0x122   :  { %v43_v17 = vsel %vm27_vm0, %v90_v16, 0.0  ;;  %v92_v22 = vpop.eup %91 }
 0x123   :  { %44 = vadd.xlane.f32.xlu1 %v43_v17  ;;  %v47_v24 = vmul.f32 %v92_v22, %v46_v23 }
 0x127   :  { %62 = vadd.xlane.f32.xlu1 %v61_v18 }
 0x12b   :  { %58 = vadd.xlane.f32.xlu1 %v57_v20 }
 0x1b0   :  { %v45_v25 = vpop.xlane.xlu1 %44 }
 0x1b1   :  { %v48_v26 = vadd.f32 %v47_v24, %v45_v25 }
 0x1b3   :  { %50 = vst.msk [vmem:[#allocation3] sm:$0xff] %vm15_vm1, %v48_v26 }
 0x1b4   :  { %v63_v28 = vpop.xlane.xlu1 %62 }
 0x1b5   :  { %v64_v29 = vmul.f32 0.00625, %v63_v28 }
 0x1b7   :  { %v65_v30 = vadd.f32 %v64_v29, %v60_v27 }
 0x1b8   :  { %v59_v31 = vpop.xlane.xlu1 %58 }
 0x1b9   :  { %v66_v32 = vmul.f32 0.9, %v59_v31 }
 0x1ba   :  { %v73_v33 = vld [vmem:[#allocation3] sm:$0xff] }
 0x1bb   :  { %93 = vlog2.f32 %v73_v33  ;;  %v67_v34 = vadd.f32 %v66_v32, %v65_v30 }
 0x1bd   :  { %68 = vst.msk [vmem:[#allocation4] sm:$0xff] %vm15_vm1, %v67_v34 }
 0x1c4   :  { %v77_v39 = vld [vmem:[#allocation4] sm:$0xff] }
 0x1c5   :  { %v94_v35 = vpop.eup %93 }
 0x1c6   :  { %v75_v36 = vmul.f32 0.6931472, %v94_v35 }
 0x1c8   :  { %v76_v38 = vadd.f32 %v75_v36, %v72_v37 }
 0x1ca   :  { %v78_v40 = vsub.f32 %v76_v38, %v77_v39 }
 0x1cc   :  { %79 = vst.msk [vmem:[%s135_s2] sm:$0xff] %vm15_vm1, %v78_v40 }

</bundles_post_ra>
